<compile_context>
chip_gen: v7x
topology: tpu7x:2x2x1
jax: 0.10.0
libtpu: 0.0.40
codegen_flags: <defaults>
</compile_context>

<pallas_src>
import jax
import jax.numpy as jnp
import numpy as np
from jax.experimental import pallas as pl
from jax.experimental.pallas import tpu as pltpu

_HALF_PI = 1.5707963267948966


def _ctanh_kernel(x_ref, o_ref):
    # Block shape (block_rows, 128); lanes interleave [re, im, re, im, ...].
    x = x_ref[...].astype(jnp.float32)

    lane = jax.lax.broadcasted_iota(jnp.int32, x.shape, dimension=1)
    is_even = (lane & 1) == 0

    # Spread each complex number's real (a) and imag (b) part onto both of its
    # two lanes.  roll(x, 1)   -> out[l] = x[l-1]
    #             roll(x, 127) -> out[l] = x[l+1]   (non-negative shift for -1)
    # Wrap-around lanes are never selected (lane 0 is even, lane 127 is odd).
    a = jnp.where(is_even, x, pltpu.roll(x, 1, 1))      # [a0, a0, a1, a1, ...]
    b = jnp.where(is_even, pltpu.roll(x, 127, 1), x)    # [b0, b0, b1, b1, ...]

    t = jnp.tanh(a)                                     # EUP push #1

    # EUP push #2: one sine gives cos(b) on even lanes (sin(b + pi/2)) and
    # sin(b) on odd lanes; spread cos(b) to all lanes with one more roll.
    sz = jnp.sin(b + jnp.where(is_even, _HALF_PI, 0.0).astype(jnp.float32))
    cos_b = jnp.where(is_even, sz, pltpu.roll(sz, 1, 1))  # cos(b) on all lanes
    sin_b = sz                                             # valid on odd lanes

    sech2 = jnp.maximum(1.0 - t * t, 0.0)               # sech^2(a) >= 0
    denom = t * t + sech2 * (cos_b * cos_b)              # no cancellation
    denom = jnp.maximum(denom, 1e-37)                    # avoid 0*inf at exact pole

    inv = pl.reciprocal(denom, approx=True)               # EUP push #3
    inv = inv * (2.0 - denom * inv)                       # Newton step (VPU, hidden)

    real = t * inv                                        # Re tanh(z) (even lanes)
    imag = sin_b * cos_b * sech2 * inv                    # Im tanh(z) (odd lanes)
    o_ref[...] = jnp.where(is_even, real, imag).astype(o_ref.dtype)


def _round_up(x, m):
    return ((x + m - 1) // m) * m


def ctanh(x):
    """Complex tanh of x, where x[..., 0] = real part, x[..., 1] = imag part."""
    assert x.shape[-1] == 2, "last dim must hold [real, imag]"
    orig_shape = x.shape
    total = 1
    for d in orig_shape:
        total *= int(d)

    # Free, contiguous reshape: interleaved [re, im, re, im, ...] lanes.
    flat = x.reshape(-1)

    rows = _round_up(pl.cdiv(total, 128), 8)
    padded_total = rows * 128
    if padded_total != total:
        # TODO(synk): process the <1024-element ragged tail separately to avoid
        # this full-array pad/slice copy on unaligned shapes.
        flat = jnp.pad(flat, (0, padded_total - total))
    arr = flat.reshape(rows, 128)

    # >= ~8 grid steps for big inputs (v7x megacore + pipelining), capped at
    # 2048 rows (1 MiB f32 block; in+out double-buffered = 4 MiB VMEM).
    block_rows = min(2048, _round_up(pl.cdiv(rows, 8), 8))
    grid = (pl.cdiv(rows, block_rows),)
    spec = pl.BlockSpec((block_rows, 128), lambda i: (i, 0))

    out = pl.pallas_call(
        _ctanh_kernel,
        grid=grid,
        in_specs=[spec],
        out_specs=spec,
        out_shape=jax.ShapeDtypeStruct((rows, 128), x.dtype),
        compiler_params=pltpu.CompilerParams(
            dimension_semantics=("parallel",),
        ),
    )(arr)

    out = out.reshape(-1)
    if padded_total != total:
        out = out[:total]
    return out.reshape(orig_shape)


if __name__ == "__main__":
    key = jax.random.PRNGKey(0)
    # small NCHW complex tensor: batch=2, channels=4, spatial=16x16, complex dim=2
    x = jax.random.normal(key, (2, 4, 16, 16, 2), dtype=jnp.float32)

    out = jax.block_until_ready(ctanh(x))

    # Reference: float64 complex tanh (exact ground truth for the f32 inputs).
    xh = np.asarray(x).astype(np.float64)
    ref = np.tanh(xh[..., 0] + 1j * xh[..., 1])

    out_np = np.asarray(out).astype(np.float64)
    out_c = out_np[..., 0] + 1j * out_np[..., 1]

    # Error measured against the complex magnitude: near the poles of tanh the
    # result magnitude blows up and any f32 implementation carries relative
    # error ~ eps * |tanh(z)|; away from poles elements match to ~1e-7.
    err = np.abs(out_c - ref)
    tol = 1e-3 * np.abs(ref) + 1e-5
    assert np.all(err <= tol), (
        f"max tolerance violation: {float(np.max(err - tol))}"
    )
    rel = err / (np.abs(ref) + 1e-30)
    assert float(np.median(rel)) < 1e-5, (
        f"median relative error too large: {float(np.median(rel))}"
    )
    print("KERNEL_OK")
</pallas_src>

<mosaic_0001>
module attributes {stable_mosaic.version = 11 : i64} {
  func.func @_ctanh_kernel(%arg0: i32, %arg1: memref<8x128xf32, #tpu.memory_space<vmem>>, %arg2: memref<8x128xf32, #tpu.memory_space<vmem>>) attributes {dimension_semantics = [#tpu.dimension_semantics<parallel>], iteration_bounds = array<i64: 4>, scalar_prefetch = 0 : i64, scratch_operands = 0 : i64, tpu.core_type = #tpu.core_type<tc>, window_params = [{transform_indices = @transform_0, window_bounds = array<i64: 8, 128>}, {transform_indices = @transform_1, window_bounds = array<i64: 8, 128>}]} {
    %c0 = arith.constant 0 : index
    %c0_0 = arith.constant 0 : index
    %0 = vector.load %arg1[%c0, %c0_0] : memref<8x128xf32, #tpu.memory_space<vmem>>, vector<8x128xf32>
    %1 = tpu.iota {dimensions = array<i32: 1>} : vector<8x128xi32>
    %c1_i32 = arith.constant 1 : i32
    %2 = vector.broadcast %c1_i32 : i32 to vector<8x128xi32>
    %3 = arith.andi %1, %2 : vector<8x128xi32>
    %c0_i32 = arith.constant 0 : i32
    %4 = vector.broadcast %c0_i32 : i32 to vector<8x128xi32>
    %5 = arith.cmpi eq, %3, %4 : vector<8x128xi32>
    %c1_i32_1 = arith.constant 1 : i32
    %6 = tpu.dynamic_rotate %0 by %c1_i32_1 dim 1 : vector<8x128xf32>, i32 -> vector<8x128xf32>
    %7 = arith.select %5, %0, %6 : vector<8x128xi1>, vector<8x128xf32>
    %c127_i32 = arith.constant 127 : i32
    %8 = tpu.dynamic_rotate %0 by %c127_i32 dim 1 : vector<8x128xf32>, i32 -> vector<8x128xf32>
    %9 = arith.select %5, %8, %0 : vector<8x128xi1>, vector<8x128xf32>
    %10 = math.tanh %7 : vector<8x128xf32>
    %cst = arith.constant 1.57079637 : f32
    %cst_2 = arith.constant 0.000000e+00 : f32
    %11 = vector.broadcast %cst : f32 to vector<8x128xf32>
    %12 = vector.broadcast %cst_2 : f32 to vector<8x128xf32>
    %13 = arith.select %5, %11, %12 : vector<8x128xi1>, vector<8x128xf32>
    %14 = arith.addf %9, %13 : vector<8x128xf32>
    %15 = math.sin %14 : vector<8x128xf32>
    %c1_i32_3 = arith.constant 1 : i32
    %16 = tpu.dynamic_rotate %15 by %c1_i32_3 dim 1 : vector<8x128xf32>, i32 -> vector<8x128xf32>
    %17 = arith.select %5, %15, %16 : vector<8x128xi1>, vector<8x128xf32>
    %18 = arith.mulf %10, %10 : vector<8x128xf32>
    %cst_4 = arith.constant 1.000000e+00 : f32
    %19 = vector.broadcast %cst_4 : f32 to vector<8x128xf32>
    %20 = arith.subf %19, %18 : vector<8x128xf32>
    %cst_5 = arith.constant 0.000000e+00 : f32
    %21 = vector.broadcast %cst_5 : f32 to vector<8x128xf32>
    %22 = arith.maximumf %20, %21 : vector<8x128xf32>
    %23 = arith.mulf %10, %10 : vector<8x128xf32>
    %24 = arith.mulf %17, %17 : vector<8x128xf32>
    %25 = arith.mulf %22, %24 : vector<8x128xf32>
    %26 = arith.addf %23, %25 : vector<8x128xf32>
    %cst_6 = arith.constant 9.99999991E-38 : f32
    %27 = vector.broadcast %cst_6 : f32 to vector<8x128xf32>
    %28 = arith.maximumf %26, %27 : vector<8x128xf32>
    %29 = tpu.reciprocal %28 {approx = true} : vector<8x128xf32> -> vector<8x128xf32>
    %30 = arith.mulf %28, %29 : vector<8x128xf32>
    %cst_7 = arith.constant 2.000000e+00 : f32
    %31 = vector.broadcast %cst_7 : f32 to vector<8x128xf32>
    %32 = arith.subf %31, %30 : vector<8x128xf32>
    %33 = arith.mulf %29, %32 : vector<8x128xf32>
    %34 = arith.mulf %10, %33 : vector<8x128xf32>
    %35 = arith.mulf %15, %17 : vector<8x128xf32>
    %36 = arith.mulf %35, %22 : vector<8x128xf32>
    %37 = arith.mulf %36, %33 : vector<8x128xf32>
    %38 = arith.select %5, %34, %37 : vector<8x128xi1>, vector<8x128xf32>
    %c0_8 = arith.constant 0 : index
    %c0_9 = arith.constant 0 : index
    %39 = vector.load %arg2[%c0_8, %c0_9] : memref<8x128xf32, #tpu.memory_space<vmem>>, vector<8x128xf32>
    tpu.vector_store %arg2[%c0_8, %c0_9], %38 {strides = array<i32>} : memref<8x128xf32, #tpu.memory_space<vmem>>, vector<8x128xf32>,
    return
  }
  func.func @transform_0(%arg0: i32) -> (i32, i32) {
    %c0_i32 = arith.constant 0 : i32
    %c0_i32_0 = arith.constant 0 : i32
    return %arg0, %c0_i32 : i32, i32
  }
  func.func @transform_1(%arg0: i32) -> (i32, i32) {
    %c0_i32 = arith.constant 0 : i32
    %c0_i32_0 = arith.constant 0 : i32
    return %arg0, %c0_i32 : i32, i32
  }
}

</mosaic_0001>

<bundles_post_ra>
// kernel: tpu_custom_call.1
= control target key start
LH: loop header
LB: loop body
LE: loop exit
PB: predicated region body
PF: predicated region fallthrough
CT: control target
= control target key end

     0   :  { %6 = vsyncpa [#allocation3], 0  ;;  %s762_s0 = inlined_call_operand.hbm [shape: f32[32,128], index: 0, kind: input, shape index: {}]   ;;  %s763_s1 = inlined_call_operand.hbm [shape: f32[32,128], index: 1, kind: output, shape index: {}]  }
   0x1   :  { %8 = vsyncpa [#allocation3 + $0x1], 0 }
   0x2   :  { %9 = vsyncpa [#allocation4], 0 }
   0x3   :  { %11 = vsyncpa [#allocation4 + $0x1], 0  ;;  %s556_s6 = smov 0   ;;  %s558_s7 = smov 0  }
   0x4   :  { %s560_s8 = smov 0   ;;  %s562_s9 = smov 0  }
   0x5 LB: > { %s577_s10 = sadd.s32 4294967295, %s533_s9   ;;  %s354_s11 = sadd.s32 4294967294, %s533_s9   ;;  %s533_s9 = sphi %s562_s9, %s779_s9   ;;  %s529_s8 = sphi %s560_s8, %s778_s8   ;;  %s525_s7 = sphi %s558_s7, %s777_s7   ;;  %s521_s6 = sphi %s556_s6, %s776_s6  }
   0x6   : > { %s581_s12 = sadd.s32 1, %s533_s9   ;;  %s24_s13 = sadd.s32 1, %s529_s8 }
   0x7   : > { %s21_s14 = ssub.s32 %s533_s9, %s581_s12  ;;  %p31_p0 = scmp.ne.s32.totalorder %s529_s8, %s525_s7 }
   0x8   : > { %p22_p1 = scmp.eq.s32.totalorder %s21_s14, 0  ;;  %p32_p2 = scmp.eq.s32.totalorder %s533_s9, 0 }
   0x9   : > { %p37_p3 = scmp.ne.s32.totalorder %s525_s7, %s521_s6  ;;  %p38_p4 = scmp.eq.s32.totalorder %s577_s10, 0 }
   0xa   : > { %s593_s15 = scalar_select %p22_p1, %s529_s8, %s24_s13  }
   0xb   : > { %p595_p5 = por %p32_p2, %p31_p0  ;;  %p599_p6 = por %p38_p4, %p37_p3 }
   0xc   : > { %p61_p7 = scmp.eq.s32.totalorder %s577_s10, 3  ;;  %p67_p8 = scmp.eq.s32.totalorder %s354_s11, 3 }
   0xd   : > { %p386_p9 = scmp.lt.s32.totalorder %s533_s9, 4  ;;  %s87_s20 = sand.u32 1, %s529_s8  }
   0xe   : > { %p605_p10 = por %p61_p7, %p31_p0  ;;  %p609_p11 = por %p67_p8, %p37_p3 }
   0xf   : > { %s358_s21 = sshll.u32 %s533_s9, 7  ;;  %s357_s22 = sshll.u32 %s87_s20, 3 }
  0x10   : > { %s767_s18 = scalar_select %p605_p10, 1, 0 }
  0x11   : > { %s768_s19 = scalar_select %p609_p11, 1, 0 }
  0x12   : > { %s618_s25 = scalar_lea.hbm %s762_s0, %s358_s21  ;;  %s91_s26 = scalar_lea.vmem [#allocation2], %s357_s22 }
  0x13   : > { %s98_s27 = sshll.u32 %s91_s26, 4  ;;  %p622_p12 = pnand %p386_p9, %p595_p5  ;;  %s626_s27 = int_to_ptr.vmem [resolvable:$true] %s98_s27 }
  0x14   : > { %s88_s29 = scalar_lea.sflag [#allocation3], %s87_s20  ;;  %s437_s30 = scalar_lea.hbm %s618_s25, 128 }
  0x15   : > { %p438_p1 = scmp.ne.s32.totalorder %s618_s25, %s437_s30  ;;  %p439_p2 = pneg %p622_p12 }
  0x16   : > { %s442_s4 = scalar_lea.hbm %s762_s0, 512  ;;  %p443_p5 = scmp.lt.u32.totalorder %s618_s25, %s762_s0 }
  0x17   : > { %p440_p3 = pnand %p439_p2, %p438_p1  ;;  %p444_p7 = scmp.lt.u32.totalorder %s442_s4, %s437_s30 }
  0x18   : > { %p446_p9 = scmp.lt.u32.totalorder %s437_s30, %s618_s25 }
  0x19   : > { %p441_p4 = pneg %p440_p3  ;;  %p445_p8 = por %p444_p7, %p443_p5 }
  0x1b   : > { %p447_p13 = por %p446_p9, %p445_p8 }
  0x1d   : > { %p448_p0 = pnand %p447_p13, %p441_p4 }
  0x1f   : > { %451 = shalt.err (!%p448_p0)
}
  0x20   : > { %s452_s13 = scalar_lea.vmem %s626_s27, 128  ;;  %s535_s14 = smov [#allocation2]  }
  0x21   : > { %p453_p1 = scmp.ne.s32.totalorder %s626_s27, %s452_s13  ;;  %s457_s16 = sshll.u32 %s535_s14, 4  ;;  %s458_s16 = int_to_ptr.vmem [resolvable:$false] %s457_s16 }
  0x22   : > { %s459_s20 = scalar_lea.vmem %s458_s16, 256  ;;  %p460_p10 = scmp.lt.s32.totalorder %s626_s27, %s458_s16 }
  0x23   : > { %p455_p3 = pnand %p453_p1, %p439_p2  ;;  %p461_p5 = scmp.lt.s32.totalorder %s459_s20, %s452_s13 }
  0x25   : > { %p456_p11 = pneg %p455_p3  ;;  %p462_p7 = por %p461_p5, %p460_p10 }
  0x27   : > { %p463_p8 = pnand %p462_p7, %p456_p11 }
  0x29   : > { %466 = shalt.err (!%p463_p8)
}
  0x2a   : > { %381 = dma.hbm_to_vmem [thread:$0]  (!%p622_p12), %s618_s25, 128, %s626_s27, %s88_s29  }
  0x2b   : > { %p770_p13 = scmp.lt.s32.totalorder %s533_s9, 5  ;;  %p771_p0 = scmp.ge.s32.totalorder %s533_s9, 1 }
  0x2d   : > { %p104_p2 = pnand %p771_p0, %p770_p13 }
  0x2e   : > { %s660_s21 = sand.u32 (!%p104_p2), 1, %s525_s7  }
  0x2f   : > { %107 = sbr.rel (%p104_p2) target bundleno = 411 (0x19b), region = 24  ;;  %s360_s22 = sshll.u32 (!%p104_p2), %s660_s21, 3 }
  0x30   : > { %s110_s23 = scalar_lea.sflag (!%p104_p2), [#allocation3], %s660_s21  ;;  %s113_s24 = scalar_lea.vmem (!%p104_p2), [#allocation2], %s360_s22 }
  0x36   : > { %512 = dma.done.wait (%p599_p6), %s110_s23, 128  }
  0x37   : > { %514 = vsyncadd (%p599_p6), %s110_s23, 4294967168  ;;  %v670_v0 = vld [vmem:[%s113_s24] sm:$0xff]  ;;  %s536_s25 = smov 127   ;;  %s537_s26 = smov 1   ;;  %v133_v1 = vlaneseq  ;;  %v538_v5 = vmov 0.0  }
  0x38   : > { %140 = vrot.lane.b32.xlu0 %v670_v0, %s536_s25  ;;  %v539_v21 = vmov 2102212464   ;;  %v540_v23 = vmov 920167782   ;;  %v541_v27 = vmov 1326507024  }
  0x39   : > { %v134_v2 = vand.u32 127, %v133_v1  ;;  %v542_v29 = vmov 683565275   ;;  %v543_v31 = vmov 2475754826   ;;  %s367_s17 = sshll.u32 %s577_s10, 7 }
  0x3a   : > { %v544_v34 = vmov 2131351028   ;;  %s131_s27 = scalar_lea.vmem [#allocation5], %s360_s22  ;;  %s717_s2 = scalar_lea.hbm %s763_s1, %s367_s17 }
  0x3b   : > { %v135_v3 = vand.u32 1, %v134_v2  ;;  %s284_s28 = sshll.u32 %s131_s27, 4  ;;  %s271_s10 = scalar_lea.sflag [#allocation4], %s660_s21  ;;  %s719_s28 = int_to_ptr.vmem [resolvable:$true] %s284_s28 }
  0x3c   : > { %137 = vrot.lane.b32.xlu0 %v670_v0, %s537_s26  ;;  %s467_s3 = scalar_lea.vmem %s719_s28, 128  ;;  %p774_p10 = scmp.ne.s32.totalorder %s767_s18, 0 }
  0x3d   : > { %vm675_vm0 = vcmp.eq.s32.totalorder %v135_v3, 0  ;;  %p468_p6 = scmp.ne.s32.totalorder %s719_s28, %s467_s3  ;;  %s545_s4 = smov [#allocation5]  }
  0x3e   : > { %v144_v6 = vsel %vm675_vm0, 1.5707964, %v538_v5  ;;  %s471_s5 = sshll.u32 %s545_s4, 4  ;;  %s472_s5 = int_to_ptr.vmem [resolvable:$false] %s471_s5 }
  0x3f   : > { %p469_p11 = pnand %p468_p6, %p774_p10  ;;  %s473_s11 = scalar_lea.vmem %s472_s5, 256 }
  0x40   : > { %p474_p4 = scmp.lt.s32.totalorder %s719_s28, %s472_s5  ;;  %p475_p9 = scmp.lt.s32.totalorder %s473_s11, %s467_s3 }
  0x41   : > { %p470_p12 = pneg %p469_p11 }
  0x42   : > { %p476_p1 = por %p475_p9, %p474_p4 }
  0x44   : > { %p477_p3 = pnand %p476_p1, %p470_p12 }
  0xaa   : > { %v141_v7 = vpop.permute.xlu0 %140 }
  0xab   : > { %v142_v8 = vsel %vm675_vm0, %v141_v7, %v670_v0 }
  0xac   : > { %v684_v9 = vadd.f32 %v144_v6, %v142_v8 }
  0xae   : > { %v149_v10 = vand.u32 2139095040, %v684_v9  ;;  %v146_v11 = vand.u32 2147483647, %v684_v9  ;;  %vm148_vm8 = vcmp.lt.s32.totalorder %v684_v9, 0  ;;  %vm238_vm13 = vweird.f32 %v684_v9 }
  0xb0   : > { %v150_v12 = vshrl.u32 %v149_v10, 23  ;;  %v153_v14 = vand.u32 8388607, %v146_v11  ;;  %vm147_vm9 = vcmp.le.f32.partialorder %v146_v11, 0.7853982 }
  0xb2   : > { %v362_v13 = vadd.s32 4294967169, %v150_v12  ;;  %v154_v17 = vor.u32 8388608, %v153_v14 }
  0xb4   : > { %v156_v15 = vadd.s32 1, %v362_v13  ;;  %v194_v25 = vshll.u32 %v154_v17, 8 }
  0xb6   : > { %vm157_vm1 = vcmp.gt.s32.totalorder %v156_v15, 0 }
  0xb7   : > { %v158_v16 = vsel %vm157_vm1, %v156_v15, 0 }
  0xb8   : > { %v160_v18 = vand.u32 31, %v158_v16  ;;  %v159_v19 = vshrl.u32 %v158_v16, 5 }
  0xba   : > { %v161_v20 = vsub.s32 32, %v160_v18  ;;  %v172_v22 = vshll.u32 %v539_v21, %v160_v18  ;;  %v175_v24 = vshll.u32 %v540_v23, %v160_v18  ;;  %v163_v30 = vshll.u32 %v542_v29, %v160_v18 }
  0xbb   : > { %v166_v33 = vshll.u32 %v543_v31, %v160_v18  ;;  %v169_v36 = vshll.u32 %v544_v34, %v160_v18  ;;  %vm181_vm2 = vcmp.lt.s32.totalorder %v159_v19, 4  ;;  %vm178_vm3 = vcmp.lt.s32.totalorder %v159_v19, 1 }
  0xbc   : > { %v173_v26 = vshrl.u32 %v540_v23, %v161_v20  ;;  %v176_v28 = vshrl.u32 %v541_v27, %v161_v20  ;;  %v164_v32 = vshrl.u32 %v543_v31, %v161_v20  ;;  %v167_v35 = vshrl.u32 %v544_v34, %v161_v20 }
  0xbd   : > { %v170_v37 = vshrl.u32 %v539_v21, %v161_v20  ;;  %v162_v41 = vshrl.u32 %v542_v29, %v161_v20  ;;  %vm179_vm4 = vcmp.lt.s32.totalorder %v159_v19, 2  ;;  %vm180_vm5 = vcmp.lt.s32.totalorder %v159_v19, 3 }
  0xbe   : > { %v174_v38 = vor.u32 %v173_v26, %v172_v22  ;;  %v177_v39 = vor.u32 %v176_v28, %v175_v24  ;;  %v165_v40 = vor.u32 %v164_v32, %v163_v30  ;;  %v168_v42 = vor.u32 %v167_v35, %v166_v33 }
  0xbf   : > { %v171_v43 = vor.u32 %v170_v37, %v169_v36 }
  0xc0   : > { %v187_v44 = vsel %vm181_vm2, %v174_v38, 920167782  ;;  %v191_v45 = vsel %vm181_vm2, %v177_v39, 1326507024  ;;  %v186_v47 = vsel %vm178_vm3, %v165_v40, %v168_v42  ;;  %v182_v50 = vsel %vm178_vm3, %v162_v41, %v165_v40  ;;  %v138_v40 = vpop.permute.xlu0 %137 }
  0xc1   : > { %v183_v46 = vsel %vm181_vm2, %v171_v43, 2102212464  ;;  %v188_v48 = vsel %vm180_vm5, %v171_v43, %v187_v44  ;;  %v190_v49 = vsel %vm178_vm3, %v168_v42, %v171_v43  ;;  %v192_v53 = vsel %vm180_vm5, %v174_v38, %v191_v45 }
  0xc2   : > { %v184_v51 = vsel %vm180_vm5, %v168_v42, %v183_v46  ;;  %v189_v52 = vsel %vm179_vm4, %v186_v47, %v188_v48  ;;  %v193_v54 = vsel %vm179_vm4, %v190_v49, %v192_v53  ;;  %v139_v41 = vsel %vm675_vm0, %v670_v0, %v138_v40 }
  0xc3   : > { %v690_v55 = vmul.u32.u64.low %v194_v25, %v189_v52  ;;  %v691_v56 = vmul.u32.u64.high %v194_v25, %v189_v52, %v690_v55  ;;  %v693_v57 = vmul.u32.u64.low %v194_v25, %v193_v54  ;;  %v694_v58 = vmul.u32.u64.high %v194_v25, %v193_v54, %v693_v57 }
  0xc4   : > { %v185_v59 = vsel %vm179_vm4, %v182_v50, %v184_v51 }
  0xc5   : > { %v204_v60 = vadd.s32 1, %v691_v56  ;;  %v201_v61 = vmul.u32 %v194_v25, %v185_v59  ;;  %vm203_vm6 = vc.u32 %v694_v58, %v690_v55  ;;  %v202_v13 = vadd.s32 %v690_v55, %v694_v58 }
  0xc7   : > { %v205_v62 = vsel %vm203_vm6, %v204_v60, %v691_v56 }
  0xc8   : > { %v206_v63 = vadd.s32 %v205_v62, %v201_v61 }
  0xca   : > { %v207_v1 = vadd.s32 536870912, %v206_v63 }
  0xcc   : > { %v208_v2 = vshrl.u32 %v207_v1, 30 }
  0xce   : > { %v209_v3 = vshll.u32 %v208_v2, 30  ;;  %v232_v25 = vsub.s32 4, %v208_v2 }
  0xd0   : > { %v210_v5 = vsub.s32 %v206_v63, %v209_v3  ;;  %v233_v28 = vsel %vm148_vm8, %v232_v25, %v208_v2 }
  0xd1   : > { %v235_v30 = vsel %vm147_vm9, 0, %v233_v28 }
  0xd2   : > { %v212_v6 = vsub.s32 0, %v210_v5  ;;  %v239_v31 = vadd.s32 3, %v235_v30 }
  0xd4   : > { %v363_v7 = vmin.u32 %v212_v6, %v210_v5  ;;  %v240_v32 = vand.u32 3, %v239_v31 }
  0xd6   : > { %v214_v8 = vclz %v363_v7  ;;  %vm245_vm10 = vcmp.eq.s32.totalorder %v240_v32, 2  ;;  %vm242_vm11 = vcmp.eq.s32.totalorder %v240_v32, 0  ;;  %vm241_vm12 = vcmp.lt.s32.totalorder %v240_v32, 2 }
  0xd8   : > { %v364_v10 = vadd.s32 4294967294, %v214_v8 }
  0xda   : > { %vm365_vm7 = vcmp.lt.s32.totalorder %v364_v10, 0 }
  0xdb   : > { %v217_v12 = vsel %vm365_vm7, 0, %v364_v10 }
  0xdc   : > { %v218_v14 = vsub.s32 32, %v217_v12  ;;  %v222_v15 = vsub.s32 4294967266, %v217_v12  ;;  %v219_v16 = vshll.u32 %v210_v5, %v217_v12 }
  0xde   : > { %v220_v17 = vshrl.u32 %v202_v13, %v218_v14  ;;  %v223_v18 = vadd.s32 127, %v222_v15 }
  0xe0   : > { %v221_v19 = vor.u32 %v220_v17, %v219_v16  ;;  %v224_v20 = vshll.u32 %v223_v18, 23 }
  0xe2   : > { %v225_v21 = vor.u32 4788187, %v224_v20  ;;  %v228_v23 = vcvt.s32.f32 %v221_v19 }
  0xe4   : > { %v226_v22 = vand.u32 2147483647, %v225_v21 }
  0xe6   : > { %v229_v24 = vmul.f32 %v228_v23, %v226_v22 }
  0xe8   : > { %v230_v26 = vxor.u32 2147483648, %v229_v24 }
  0xea   : > { %v231_v27 = vsel %vm148_vm8, %v230_v26, %v229_v24 }
  0xeb   : > { %v234_v29 = vsel %vm147_vm9, %v684_v9, %v231_v27 }
  0xec   : > { %429 = vcosq.f32 %v234_v29 }
  0xed   : > { %431 = vsinq.f32 %v234_v29 }
  0xee   : > { %433 = vtanh.f32 %v139_v41 }
  0xf6   : > { %v430_v33 = vpop.eup %429 }
  0xf7   : > { %v432_v34 = vpop.eup %431  ;;  %v246_v35 = vxor.u32 2147483648, %v430_v33 }
  0xf8   : > { %v243_v36 = vxor.u32 2147483648, %v432_v34  ;;  %v434_v42 = vpop.eup %433 }
  0xf9   : > { %v247_v37 = vsel %vm245_vm10, %v246_v35, %v432_v34  ;;  %v253_v43 = vmul.f32 %v434_v42, %v434_v42 }
  0xfa   : > { %v244_v38 = vsel %vm242_vm11, %v430_v33, %v243_v36 }
  0xfb   : > { %v248_v11 = vsel %vm241_vm12, %v244_v38, %v247_v37  ;;  %v254_v44 = vsub.f32 1.0, %v253_v43 }
  0xfc   : > { %v249_v39 = vsel %vm238_vm13, nan, %v248_v11 }
  0xfd   : > { %250 = vrot.lane.b32.xlu1 %v249_v39, %s537_s26  ;;  %v255_v46 = vmax.f32 %v254_v44, 0.0 }
 0x16f   : > { %v251_v45 = vpop.permute.xlu1 %250 }
 0x170   : > { %v252_v9 = vsel %vm675_vm0, %v249_v39, %v251_v45 }
 0x171   : > { %v256_v47 = vmul.f32 %v252_v9, %v252_v9  ;;  %v265_v0 = vmul.f32 %v252_v9, %v249_v39 }
 0x173   : > { %v257_v48 = vmul.f32 %v256_v47, %v255_v46  ;;  %v266_v55 = vmul.f32 %v265_v0, %v255_v46 }
 0x175   : > { %v258_v49 = vadd.f32 %v257_v48, %v253_v43 }
 0x177   : > { %v259_v50 = vmax.f32 %v258_v49, 1e-37 }
 0x179   : > { %435 = vrcp.f32 %v259_v50 }
 0x183   : > { %v436_v51 = vpop.eup %435 }
 0x184   : > { %v261_v52 = vmul.f32 %v436_v51, %v259_v50 }
 0x186   : > { %v262_v53 = vsub.f32 2.0, %v261_v52 }
 0x188   : > { %v263_v54 = vmul.f32 %v436_v51, %v262_v53 }
 0x18a   : > { %v264_v56 = vmul.f32 %v434_v42, %v263_v54  ;;  %v267_v57 = vmul.f32 %v266_v55, %v263_v54 }
 0x18c   : > { %v268_v58 = vsel %vm675_vm0, %v264_v56, %v267_v57 }
 0x18d   : > { %269 = vst [vmem:[%s131_s27] sm:$0xff] %v268_v58 }
 0x18e   : > { %480 = shalt.err (!%p477_p3)
}
 0x18f   : > { %s481_s13 = scalar_lea.hbm %s717_s2, 128  ;;  %s485_s20 = scalar_lea.hbm %s763_s1, 512 }
 0x190   : > { %p482_p5 = scmp.ne.s32.totalorder %s717_s2, %s481_s13  ;;  %p486_p13 = scmp.lt.u32.totalorder %s717_s2, %s763_s1 }
 0x191   : > { %p487_p0 = scmp.lt.u32.totalorder %s485_s20, %s481_s13  ;;  %p489_p6 = scmp.lt.u32.totalorder %s481_s13, %s717_s2 }
 0x192   : > { %p483_p7 = pnand %p482_p5, %p774_p10 }
 0x193   : > { %p488_p2 = por %p487_p0, %p486_p13 }
 0x194   : > { %p484_p8 = pneg %p483_p7 }
 0x195   : > { %p490_p11 = por %p489_p6, %p488_p2 }
 0x197   : > { %p491_p12 = pnand %p490_p11, %p484_p8 }
 0x199   : > { %494 = shalt.err (!%p491_p12)
}
 0x19a   : > { %376 = dma.vmem_to_hbm [thread:$0]  (%p774_p10), %s719_s28, 128, %s717_s2, %s271_s10  }
 0x19b PF: > { %p387_p4 = scmp.ge.s32.totalorder %s533_s9, 2  ;;  %s296_s23 = sand.u32 1, %s521_s6  }
 0x19c   : > { %p775_p9 = scmp.ne.s32.totalorder %s768_s19, 0  ;;  %s297_s24 = scalar_lea.sflag [#allocation4], %s296_s23 }
 0x19e   : > { %p383_p1 = pnand %p387_p4, %p775_p9 }
 0x1a0   : > { %516 = dma.done.wait (!%p383_p1), %s297_s24, 128  }
 0x1a1   : > { %518 = vsyncadd (!%p383_p1), %s297_s24, 4294967168  ;;  %p14_p3 = scmp.ge.s32.totalorder %s581_s12, 6   ;;  %s776_s6 = smov %s525_s7 }
 0x1a2   : > { %s777_s7 = smov %s529_s8  ;;  %s778_s8 = smov %s593_s15 }
 0x1a3   : > { %s779_s9 = smov %s581_s12  ;;  %16 = sbr.rel (!%p14_p3) target bundleno = 5 (0x5), region = 69 }
 0x1aa   :  { %302 = vsyncpa [#allocation3], 1 }
 0x1ab   :  { %304 = vsyncpa [#allocation3 + $0x1], 1 }
 0x1ac   :  { %305 = vsyncpa [#allocation4], 1 }
 0x1ad   :  { %307 = vsyncpa [#allocation4 + $0x1], 1 }

</bundles_post_ra>
